<compile_context>
chip_gen: v6e
topology: v6e:2x2x1
jax: 0.10.0
libtpu: 0.0.40
codegen_flags: <defaults>
</compile_context>

<pallas_src>
import functools

import jax
import jax.numpy as jnp
from jax.experimental import pallas as pl
from jax.experimental.pallas import tpu as pltpu


def _charbonnier_kernel(x_ref, y_ref, o_ref, *, rt, r_valid, needs_mask):
    """Accumulate per-batch, per-lane sums of squared differences.

    x_ref, y_ref : (1, rt, 128) tile of one batch row (original dtype)
    o_ref        : (1, 8, 128)  per-batch per-lane accumulator (f32), resident
                   across the reduction grid axis.
    """
    r_idx = pl.program_id(1)

    @pl.when(r_idx == 0)
    def _():
        o_ref[...] = jnp.zeros_like(o_ref)

    diff = x_ref[...].astype(jnp.float32) - y_ref[...].astype(jnp.float32)
    sq = diff * diff                                        # (1, rt, 128)

    def accum(vals):
        # Fold groups of 8 sublane rows onto the (8, 128) accumulator: pure
        # VPU elementwise adds, no cross-lane work in the hot loop.
        o_ref[...] += jnp.sum(vals.reshape(1, rt // 8, 8, 128), axis=1)

    if needs_mask:
        last = pl.num_programs(1) - 1

        @pl.when(r_idx != last)
        def _():
            accum(sq)

        @pl.when(r_idx == last)
        def _():
            # Zero rows past the valid extent (partial last tile) — only the
            # final grid step pays the iota/compare/select cost.
            rows = r_idx * rt + jax.lax.broadcasted_iota(
                jnp.int32, (1, rt, 128), 1
            )
            accum(jnp.where(rows < r_valid, sq, 0.0))
    else:
        accum(sq)


def charbonnier_loss(x, y, epsilon=0.001, *, block_bytes=4 * 1024 * 1024):
    """Pallas implementation of Charbonnier_loss.forward."""
    assert x.shape == y.shape and x.ndim >= 2, "expected equal-shape batched inputs"
    n = x.shape[0]
    d = 1
    for s in x.shape[1:]:
        d *= s
    eps = float(epsilon) ** 2

    # Flatten the reduction dims; keep the ORIGINAL dtype in HBM (upcast is
    # done inside the kernel), and avoid any pre-pass when d % 128 == 0.
    x2 = x.reshape(n, d)
    y2 = y.reshape(n, d)
    if d % 128 != 0:
        # TODO(synk): rare fallback — zero-pad pass (zeros add nothing to the
        # sum of squares).  Could be replaced by in-kernel lane masking of the
        # final 128-column if this path ever matters.
        pad = 128 - d % 128
        x2 = jnp.pad(x2, ((0, 0), (0, pad)))
        y2 = jnp.pad(y2, ((0, 0), (0, pad)))
    r_rows = x2.shape[1] // 128
    x3 = x2.reshape(n, r_rows, 128)
    y3 = y2.reshape(n, r_rows, 128)

    # Row-tile size: ~block_bytes per input block, rows a multiple of 8,
    # clamped to the (8-rounded) number of rows actually present.
    itemsize = jnp.dtype(x.dtype).itemsize
    rt = block_bytes // (128 * itemsize)
    rt = max(8, (rt // 8) * 8)
    rt = min(rt, ((r_rows + 7) // 8) * 8)
    num_r = pl.cdiv(r_rows, rt)
    needs_mask = (r_rows % rt) != 0

    kernel = functools.partial(
        _charbonnier_kernel, rt=rt, r_valid=r_rows, needs_mask=needs_mask
    )

    per_lane = pl.pallas_call(
        kernel,
        out_shape=jax.ShapeDtypeStruct((n, 8, 128), jnp.float32),
        grid_spec=pltpu.PrefetchScalarGridSpec(
            num_scalar_prefetch=0,
            grid=(n, num_r),
            in_specs=[
                pl.BlockSpec((1, rt, 128), lambda b, r: (b, r, 0)),
                pl.BlockSpec((1, rt, 128), lambda b, r: (b, r, 0)),
            ],
            out_specs=pl.BlockSpec((1, 8, 128), lambda b, r: (b, 0, 0)),
        ),
        compiler_params=pltpu.CompilerParams(
            dimension_semantics=("parallel", "arbitrary"),
            vmem_limit_bytes=40 * 1024 * 1024,
        ),
    )(x3, y3)

    # Tiny epilogue in plain JAX: lane/sublane reduce per batch, +eps, sqrt,
    # sum over the batch, divide by batchsize.
    per_batch = jnp.sum(per_lane, axis=(1, 2)) + eps        # (N,)
    return jnp.sum(jnp.sqrt(per_batch)) / n


def charbonnier_loss_ref(x, y, epsilon=0.001):
    """Pure-JAX reference matching the PyTorch module."""
    eps = epsilon ** 2
    diff = x.astype(jnp.float32) - y.astype(jnp.float32)
    sq = jnp.sum(diff * diff, axis=tuple(range(1, x.ndim))) + eps
    return jnp.sum(jnp.sqrt(sq)) / x.shape[0]


if __name__ == "__main__":
    key = jax.random.PRNGKey(0)
    kx, ky = jax.random.split(key)
    shape = (2, 4, 16, 16)  # N, C, H, W
    x = jax.random.normal(kx, shape, dtype=jnp.float32)
    y = jax.random.normal(ky, shape, dtype=jnp.float32)

    loss = charbonnier_loss(x, y)
    jax.block_until_ready(loss)

    ref = charbonnier_loss_ref(x, y)
    assert jnp.allclose(loss, ref, rtol=1e-5, atol=1e-5), (loss, ref)
    print("KERNEL_OK")
</pallas_src>

<mosaic_0001>
module attributes {stable_mosaic.version = 11 : i64} {
  func.func @_charbonnier_kernel(%arg0: i32, %arg1: i32, %arg2: memref<1x8x128xf32, #tpu.memory_space<vmem>>, %arg3: memref<1x8x128xf32, #tpu.memory_space<vmem>>, %arg4: memref<1x8x128xf32, #tpu.memory_space<vmem>>) attributes {dimension_semantics = [#tpu.dimension_semantics<parallel>, #tpu.dimension_semantics<arbitrary>], iteration_bounds = array<i64: 2, 1>, scalar_prefetch = 0 : i64, scratch_operands = 0 : i64, tpu.core_type = #tpu.core_type<tc>, window_params = [{transform_indices = @transform_0, window_bounds = array<i64: 1, 8, 128>}, {transform_indices = @transform_1, window_bounds = array<i64: 1, 8, 128>}, {transform_indices = @transform_2, window_bounds = array<i64: 1, 8, 128>}]} {
    %c0_i32 = arith.constant 0 : i32
    %0 = arith.cmpi eq, %arg1, %c0_i32 : i32
    %1 = arith.extui %0 : i1 to i32
    %c0_i32_0 = arith.constant 0 : i32
    %2 = arith.cmpi ne, %1, %c0_i32_0 : i32
    scf.if %2 {
      %cst_12 = arith.constant 0.000000e+00 : f32
      %12 = vector.broadcast %cst_12 : f32 to vector<1x8x128xf32>
      %c0_13 = arith.constant 0 : index
      %c0_14 = arith.constant 0 : index
      %c0_15 = arith.constant 0 : index
      %13 = vector.load %arg4[%c0_13, %c0_14, %c0_15] : memref<1x8x128xf32, #tpu.memory_space<vmem>>, vector<1x8x128xf32>
      tpu.vector_store %arg4[%c0_13, %c0_14, %c0_15], %12 {strides = array<i32>} : memref<1x8x128xf32, #tpu.memory_space<vmem>>, vector<1x8x128xf32>,
    } else {
    }
    %c0 = arith.constant 0 : index
    %c0_1 = arith.constant 0 : index
    %c0_2 = arith.constant 0 : index
    %3 = vector.load %arg2[%c0, %c0_1, %c0_2] : memref<1x8x128xf32, #tpu.memory_space<vmem>>, vector<1x8x128xf32>
    %c0_3 = arith.constant 0 : index
    %c0_4 = arith.constant 0 : index
    %c0_5 = arith.constant 0 : index
    %4 = vector.load %arg3[%c0_3, %c0_4, %c0_5] : memref<1x8x128xf32, #tpu.memory_space<vmem>>, vector<1x8x128xf32>
    %5 = arith.subf %3, %4 : vector<1x8x128xf32>
    %6 = arith.mulf %5, %5 : vector<1x8x128xf32>
    %c0_6 = arith.constant 0 : index
    %c0_7 = arith.constant 0 : index
    %c0_8 = arith.constant 0 : index
    %7 = vector.load %arg4[%c0_6, %c0_7, %c0_8] : memref<1x8x128xf32, #tpu.memory_space<vmem>>, vector<1x8x128xf32>
    %8 = vector.shape_cast %6 : vector<1x8x128xf32> to vector<1x1x8x128xf32>
    %cst = arith.constant dense<0.000000e+00> : vector<1x8x128xf32>
    %9 = vector.multi_reduction <add>, %8, %cst [1] : vector<1x1x8x128xf32> to vector<1x8x128xf32>
    %10 = arith.addf %7, %9 : vector<1x8x128xf32>
    %c0_9 = arith.constant 0 : index
    %c0_10 = arith.constant 0 : index
    %c0_11 = arith.constant 0 : index
    %11 = vector.load %arg4[%c0_9, %c0_10, %c0_11] : memref<1x8x128xf32, #tpu.memory_space<vmem>>, vector<1x8x128xf32>
    tpu.vector_store %arg4[%c0_9, %c0_10, %c0_11], %10 {strides = array<i32>} : memref<1x8x128xf32, #tpu.memory_space<vmem>>, vector<1x8x128xf32>,
    return
  }
  func.func @transform_0(%arg0: i32, %arg1: i32) -> (i32, i32, i32) {
    %c0_i32 = arith.constant 0 : i32
    %c0_i32_0 = arith.constant 0 : i32
    return %arg0, %arg1, %c0_i32 : i32, i32, i32
  }
  func.func @transform_1(%arg0: i32, %arg1: i32) -> (i32, i32, i32) {
    %c0_i32 = arith.constant 0 : i32
    %c0_i32_0 = arith.constant 0 : i32
    return %arg0, %arg1, %c0_i32 : i32, i32, i32
  }
  func.func @transform_2(%arg0: i32, %arg1: i32) -> (i32, i32, i32) {
    %c0_i32 = arith.constant 0 : i32
    %c0_i32_0 = arith.constant 0 : i32
    %c0_i32_1 = arith.constant 0 : i32
    return %arg0, %c0_i32, %c0_i32_0 : i32, i32, i32
  }
}

</mosaic_0001>

<bundles_post_ra>
// kernel: tpu_custom_call.1
= control target key start
LH: loop header
LB: loop body
LE: loop exit
PB: predicated region body
PF: predicated region fallthrough
CT: control target
= control target key end

     0   :  { %7 = vsyncpa [#allocation3], 0  ;;  %s749_s0 = inlined_call_operand.hbm [shape: f32[2,8,128], index: 0, kind: input, shape index: {}]   ;;  %s750_s1 = inlined_call_operand.hbm [shape: f32[2,8,128], index: 1, kind: input, shape index: {}]   ;;  %s751_s2 = inlined_call_operand.hbm [shape: f32[2,8,128], index: 2, kind: output, shape index: {}]  }
   0x1   :  { %9 = vsyncpa [#allocation3 + $0x1], 0 }
   0x2   :  { %10 = vsyncpa [#allocation6], 0 }
   0x3   :  { %12 = vsyncpa [#allocation6 + $0x1], 0 }
   0x4   :  { %13 = vsyncpa [#allocation4], 0 }
   0x5   :  { %15 = vsyncpa [#allocation4 + $0x1], 0  ;;  %s588_s9 = smov 0   ;;  %s590_s10 = smov 0  }
   0x6   :  { %s592_s11 = smov 0   ;;  %s594_s12 = smov 0  }
   0x7   :  { %s596_s13 = smov 0   ;;  %s598_s14 = smov 0  }
   0x8 LB: > { %s344_s15 = sadd.s32 4294967295, %s568_s14   ;;  %s345_s16 = sadd.s32 4294967294, %s568_s14   ;;  %s568_s14 = sphi %s598_s14, %s21_s14   ;;  %s564_s13 = sphi %s596_s13, %s763_s13   ;;  %s560_s12 = sphi %s594_s12, %s762_s12   ;;  %s556_s11 = sphi %s592_s11, %s761_s11   ;;  %s552_s10 = sphi %s590_s10, %s760_s10   ;;  %s548_s9 = sphi %s588_s9, %s759_s9  }
   0x9   : > { %s33_s17 = sadd.s32 1, %s564_s13  ;;  %s42_s18 = sadd.s32 1, %s556_s11 }
   0xa   : > { %p35_p0 = scmp.ge.s32.totalorder %s33_s17, 2  ;;  %p49_p1 = scmp.ne.s32.totalorder %s556_s11, %s552_s10 }
   0xb   : > { %p50_p2 = scmp.eq.s32.totalorder %s568_s14, 0  ;;  %p55_p3 = scmp.ne.s32.totalorder %s552_s10, %s548_s9 }
   0xc   : > { %s765_s17 = smov (%p35_p0, %s33_s17), 0  ;;  %p56_p5 = scmp.eq.s32.totalorder %s344_s15, 0 }
   0xd   : > { %p629_p4 = por %p50_p2, %p49_p1  ;;  %s37_s20 = ssub.s32 %s564_s13, %s765_s17 }
   0xe   : > { %p107_p6 = scmp.eq.s32.totalorder %s344_s15, 1  ;;  %p40_p7 = scmp.eq.s32.totalorder %s37_s20, 0 }
   0xf   : > { %p635_p8 = por %p56_p5, %p55_p3  ;;  %p113_p10 = scmp.eq.s32.totalorder %s345_s16, 1 }
  0x10   : > { %p639_p9 = por %p107_p6, %p49_p1  ;;  %p377_p13 = scmp.lt.s32.totalorder %s568_s14, 2 }
  0x11   : > { %s644_s23 = scalar_select %p40_p7, %s556_s11, %s42_s18  }
  0x12   : > { %p646_p11 = por %p113_p10, %p55_p3  ;;  %s653_s25 = sand.u32 1, %s556_s11  }
  0x13   : > { %s348_s26 = sshll.u32 %s653_s25, 3  ;;  %s349_s27 = sshll.u32 %s564_s13, 7 }
  0x14   : > { %s143_s30 = scalar_lea.hbm %s749_s0, %s349_s27  ;;  %s137_s3 = scalar_lea.vmem [#allocation2], %s348_s26 }
  0x15   : > { %s145_s4 = sshll.u32 %s137_s3, 4  ;;  %p662_p0 = pnand %p377_p13, %p629_p4  ;;  %s146_s4 = int_to_ptr.vmem [resolvable:$true] %s145_s4 }
  0x16   : > { %p352_p1 = scmp.ge.s32.totalorder %s568_s14, 1  ;;  %p169_p2 = scmp.lt.s32.totalorder %s568_s14, 3 }
  0x17   : > { %s134_s6 = scalar_lea.sflag [#allocation3], %s653_s25  ;;  %p430_p3 = pneg %p662_p0 }
  0x18   : > { %s441_s7 = scalar_lea.vmem %s146_s4, 128  ;;  %s570_s8 = smov [#allocation2]  }
  0x19   : > { %p442_p5 = scmp.ne.s32.totalorder %s146_s4, %s441_s7  ;;  %s446_s15 = sshll.u32 %s570_s8, 4  ;;  %s447_s15 = int_to_ptr.vmem [resolvable:$false] %s446_s15 }
  0x1a   : > { %s448_s16 = scalar_lea.vmem %s447_s15, 256  ;;  %p449_p4 = scmp.lt.s32.totalorder %s146_s4, %s447_s15 }
  0x1b   : > { %p444_p6 = pnand %p442_p5, %p430_p3  ;;  %p450_p10 = scmp.lt.s32.totalorder %s448_s16, %s441_s7 }
  0x1d   : > { %p445_p7 = pneg %p444_p6  ;;  %p451_p13 = por %p450_p10, %p449_p4 }
  0x1f   : > { %p452_p12 = pnand %p451_p13, %p445_p7 }
  0x21   : > { %455 = shalt.err (!%p452_p12)
}
  0x22   : > { %369 = dma.hbm_to_vmem [thread:$0]  (!%p662_p0), %s143_s30, 128, %s146_s4, %s134_s6  }
  0x23   : > { %p680_p5 = pnand %p352_p1, %p169_p2  ;;  %s162_s28 = scalar_lea.hbm %s750_s1, %s349_s27 }
  0x24   : > { %s156_s29 = scalar_lea.vmem [#allocation5], %s348_s26  ;;  %s153_s7 = scalar_lea.sflag [#allocation6], %s653_s25 }
  0x25   : > { %s164_s3 = sshll.u32 %s156_s29, 4  ;;  %s571_s30 = smov [#allocation5]   ;;  %s165_s3 = int_to_ptr.vmem [resolvable:$true] %s164_s3 }
  0x26   : > { %s469_s8 = scalar_lea.vmem %s165_s3, 128  ;;  %s474_s4 = sshll.u32 %s571_s30, 4  ;;  %s475_s4 = int_to_ptr.vmem [resolvable:$false] %s474_s4 }
  0x27   : > { %p470_p12 = scmp.ne.s32.totalorder %s165_s3, %s469_s8  ;;  %s476_s6 = scalar_lea.vmem %s475_s4, 256 }
  0x28   : > { %p477_p1 = scmp.lt.s32.totalorder %s165_s3, %s475_s4  ;;  %p478_p2 = scmp.lt.s32.totalorder %s476_s6, %s469_s8 }
  0x29   : > { %p472_p6 = pnand %p470_p12, %p430_p3 }
  0x2a   : > { %p479_p4 = por %p478_p2, %p477_p1 }
  0x2b   : > { %p473_p7 = pneg %p472_p6 }
  0x2d   : > { %p480_p10 = pnand %p479_p4, %p473_p7 }
  0x2f   : > { %483 = shalt.err (!%p480_p10)
}
  0x30   : > { %372 = dma.hbm_to_vmem [thread:$0]  (!%p662_p0), %s162_s28, 128, %s165_s3, %s153_s7  }
  0x31   : > { %173 = sbr.rel (%p680_p5) target bundleno = 81 (0x51), region = 28  ;;  %s696_s25 = sand.u32 (!%p680_p5), 1, %s552_s10  }
  0x32   : > { %s353_s26 = sshll.u32 (!%p680_p5), %s696_s25, 3  ;;  %s176_s27 = scalar_lea.sflag (!%p680_p5), [#allocation3], %s696_s25 }
  0x33   : > { %s179_s15 = scalar_lea.vmem (!%p680_p5), [#allocation2], %s353_s26 }
  0x36   : > { %535 = dma.done.wait (%p635_p8), %s176_s27, 128  }
  0x37   : > { %537 = vsyncadd (%p635_p8), %s176_s27, 4294967168  ;;  %s185_s5 = scalar_lea.sflag [#allocation6], %s696_s25  ;;  %s188_s16 = scalar_lea.vmem [#allocation5], %s353_s26 }
  0x38   : > { %539 = dma.done.wait (%p635_p8), %s185_s5, 128  }
  0x39   : > { %541 = vsyncadd (%p635_p8), %s185_s5, 4294967168  ;;  %v219_v0 = vld [vmem:[%s179_s15] sm:$0xff]  ;;  %v220_v1 = vld [vmem:[%s188_s16] sm:$0xff]  ;;  %s357_s18 = sshll.u32 %s560_s12, 7  ;;  %s213_s19 = scalar_lea.vmem [#allocation7], %s353_s26 }
  0x3a   : > { %v221_v2 = vsub.f32 %v219_v0, %v220_v1  ;;  %s241_s20 = sshll.u32 %s213_s19, 4  ;;  %s239_s3 = scalar_lea.hbm %s751_s2, %s357_s18  ;;  %s242_s20 = int_to_ptr.vmem [resolvable:$true] %s241_s20 }
  0x3b   : > { %s228_s7 = scalar_lea.sflag [#allocation4], %s696_s25  ;;  %s484_s8 = scalar_lea.vmem %s242_s20, 128 }
  0x3c   : > { %v222_v3 = vmul.f32 %v221_v2, %v221_v2  ;;  %p485_p0 = scmp.ne.s32.totalorder %s242_s20, %s484_s8  ;;  %s572_s21 = smov [#allocation7]  }
  0x3d   : > { %s488_s30 = sshll.u32 %s572_s21, 4  ;;  %s489_s30 = int_to_ptr.vmem [resolvable:$false] %s488_s30 }
  0x3e   : > { %226 = vst [vmem:[%s213_s19] sm:$0xff] %v222_v3  ;;  %p486_p8 = pnand %p485_p0, %p639_p9  ;;  %s490_s4 = scalar_lea.vmem %s489_s30, 256 }
  0x3f   : > { %p491_p13 = scmp.lt.s32.totalorder %s242_s20, %s489_s30  ;;  %p492_p5 = scmp.lt.s32.totalorder %s490_s4, %s484_s8 }
  0x40   : > { %p487_p3 = pneg %p486_p8 }
  0x41   : > { %p493_p12 = por %p492_p5, %p491_p13 }
  0x43   : > { %p494_p6 = pnand %p493_p12, %p487_p3 }
  0x45   : > { %497 = shalt.err (!%p494_p6)
}
  0x46   : > { %s498_s12 = scalar_lea.hbm %s239_s3, 128  ;;  %s502_s26 = scalar_lea.hbm %s751_s2, 256 }
  0x47   : > { %p499_p7 = scmp.ne.s32.totalorder %s239_s3, %s498_s12  ;;  %p503_p4 = scmp.lt.s32.totalorder %s239_s3, %s751_s2 }
  0x48   : > { %p504_p10 = scmp.lt.s32.totalorder %s502_s26, %s498_s12 }
  0x49   : > { %p500_p1 = pnand %p499_p7, %p639_p9 }
  0x4a   : > { %p505_p0 = por %p504_p10, %p503_p4 }
  0x4b   : > { %p501_p2 = pneg %p500_p1 }
  0x4d   : > { %p506_p8 = pnand %p505_p0, %p501_p2 }
  0x4f   : > { %509 = shalt.err (!%p506_p8)
}
  0x50   : > { %364 = dma.vmem_to_hbm [thread:$0]  (%p639_p9), %s242_s20, 128, %s239_s3, %s228_s7  }
  0x51 PF: > { %s253_s5 = sand.u32 1, %s548_s9   ;;  %p758_p3 = scmp.ge.s32.totalorder %s568_s14, 2 }
  0x52   : > { %s254_s16 = scalar_lea.sflag [#allocation4], %s253_s5 }
  0x53   : > { %p374_p13 = pnand %p758_p3, %p646_p11 }
  0x55   : > { %p375_p5 = pneg %p374_p13 }
  0x57   : > { %543 = dma.done.wait (%p375_p5), %s254_s16, 128  }
  0x58   : > { %545 = vsyncadd (%p375_p5), %s254_s16, 4294967168  ;;  %s21_s14 = sadd.s32 1, %s568_s14   ;;  %s759_s9 = smov %s552_s10 }
  0x59   : > { %p18_p12 = scmp.ge.s32.totalorder %s21_s14, 4   ;;  %s760_s10 = smov %s556_s11 }
  0x5a   : > { %s761_s11 = smov %s644_s23  ;;  %s762_s12 = smov %s564_s13 }
  0x5b   : > { %s763_s13 = smov %s765_s17  ;;  %20 = sbr.rel (!%p18_p12) target bundleno = 8 (0x8), region = 90 }
  0x60   :  { %259 = vsyncpa [#allocation3], 1 }
  0x61   :  { %261 = vsyncpa [#allocation3 + $0x1], 1 }
  0x62   :  { %262 = vsyncpa [#allocation6], 1 }
  0x63   :  { %264 = vsyncpa [#allocation6 + $0x1], 1 }
  0x64   :  { %265 = vsyncpa [#allocation4], 1 }
  0x65   :  { %267 = vsyncpa [#allocation4 + $0x1], 1 }

</bundles_post_ra>
